<compile_context>
chip_gen: v7x
topology: tpu7x:2x2x1
jax: 0.10.0
libtpu: 0.0.40
codegen_flags: <defaults>
</compile_context>

<pallas_src>
import jax
import jax.numpy as jnp
from jax.experimental import pallas as pl
from jax.experimental.pallas import tpu as pltpu

MXU_DTYPE = jnp.float32 if False else jnp.bfloat16  # bf16 MXU operands (review item)
_MAX_TILE_M = 2048        # lane-tile cap (multiple of 128); bf16 cols -> ~384 KB/tile
_MAX_TILE_N = 512         # FC-head row-tile cap


def _round_up(x, m):
    return -(-x // m) * m


def _tile_and_pad_m(m, cap=_MAX_TILE_M):
    """Pick a lane tile tm (multiple of 128) and padded extent mp (= grid * tm).

    Guarantees at least 2 grid steps whenever there are >= 256 lanes of work so
    both v7x TensorCores get fed, while capping the tile for VMEM/double-buffering.
    """
    mp = _round_up(m, 128)
    ntiles = max(1, -(-mp // cap))
    if mp >= 256:
        ntiles = max(ntiles, 2)
    tm = _round_up(-(-mp // ntiles), 128)
    mp = _round_up(mp, tm)
    return tm, mp


# ---------------------------------------------------------------------------
# Pallas kernels
# ---------------------------------------------------------------------------
def _conv_kernel(w_ref, b_ref, c_ref, o_ref):
    # y^T = relu(W @ colsT + b); output (Cout_pad, tile_m) is lane-dense.
    y = jnp.dot(w_ref[...], c_ref[...], preferred_element_type=jnp.float32)
    o_ref[...] = jnp.maximum(y + b_ref[...], 0.0).astype(o_ref.dtype)


def _conv_pool_kernel(w_ref, b_ref, c00_ref, c01_ref, c10_ref, c11_ref, o_ref):
    # Fused conv + 2x2 max-pool + bias + ReLU.  Pool is max of the four raw matmul
    # results; bias/ReLU applied once after the max (max(relu(x+b)) == relu(max(x)+b)
    # for a shared bias) -> single bias broadcast, single ReLU per tile.
    w = w_ref[...]

    def raw(c_ref):
        return jnp.dot(w, c_ref[...], preferred_element_type=jnp.float32)

    pooled = jnp.maximum(jnp.maximum(raw(c00_ref), raw(c01_ref)),
                         jnp.maximum(raw(c10_ref), raw(c11_ref)))
    o_ref[...] = jnp.maximum(pooled + b_ref[...], 0.0).astype(o_ref.dtype)


def _head_kernel(x_ref, w1_ref, b1_ref, w2_ref, b2_ref, w3_ref, b3_ref, o_ref):
    # Three chained Linear layers (no activations, matching the PyTorch module).
    # All operands lane-padded; intermediates cast to the MXU dtype so every dot
    # takes the bf16 MXU path while accumulation/bias stay f32.
    h = jnp.dot(x_ref[...], w1_ref[...], preferred_element_type=jnp.float32) + b1_ref[...]
    h = jnp.dot(h.astype(w2_ref.dtype), w2_ref[...],
                preferred_element_type=jnp.float32) + b2_ref[...]
    o_ref[...] = jnp.dot(h.astype(w3_ref.dtype), w3_ref[...],
                         preferred_element_type=jnp.float32) + b3_ref[...]


# ---------------------------------------------------------------------------
# pallas_call wrappers
# ---------------------------------------------------------------------------
def _conv_matmul(w, b, cols, tm, *, pool):
    """Lane-dense conv matmul. w:(Cout_pad,Kp) b:(Cout_pad,1) cols:(Kp,Mp) or 4x."""
    cols_list = list(cols) if pool else [cols]
    cout, kp = w.shape
    mp = cols_list[0].shape[1]
    grid = (mp // tm,)

    w_spec = pl.BlockSpec((cout, kp), lambda m: (0, 0))
    b_spec = pl.BlockSpec((cout, 1), lambda m: (0, 0))
    c_spec = pl.BlockSpec((kp, tm), lambda m: (0, m))
    o_spec = pl.BlockSpec((cout, tm), lambda m: (0, m))
    kernel = _conv_pool_kernel if pool else _conv_kernel

    return pl.pallas_call(
        kernel,
        out_shape=jax.ShapeDtypeStruct((cout, mp), MXU_DTYPE),
        grid=grid,
        in_specs=[w_spec, b_spec] + [c_spec] * len(cols_list),
        out_specs=o_spec,
        compiler_params=pltpu.CompilerParams(dimension_semantics=("parallel",)),
    )(w, b, *cols_list)


def _linear_head(x, w1, b1, w2, b2, w3, b3, n_out):
    """Fused 3-layer head, tiled over the batch dimension."""
    n, kf = x.shape
    tn = min(_MAX_TILE_N, _round_up(n, 8))
    n_pad = _round_up(n, tn)
    if n_pad != n:
        x = jnp.pad(x, ((0, n_pad - n), (0, 0)))
    grid = (n_pad // tn,)
    f_out = w3.shape[1]

    def const(shape):
        nd = len(shape)
        return pl.BlockSpec(shape, lambda i: (0,) * nd)

    out = pl.pallas_call(
        _head_kernel,
        out_shape=jax.ShapeDtypeStruct((n_pad, f_out), jnp.float32),
        grid=grid,
        in_specs=[pl.BlockSpec((tn, kf), lambda i: (i, 0)),
                  const(w1.shape), const(b1.shape),
                  const(w2.shape), const(b2.shape),
                  const(w3.shape), const(b3.shape)],
        out_specs=pl.BlockSpec((tn, f_out), lambda i: (i, 0)),
        compiler_params=pltpu.CompilerParams(dimension_semantics=("parallel",)),
    )(x, w1, b1, w2, b2, w3, b3)
    return out[:n, :n_out]


# ---------------------------------------------------------------------------
# Host-side glue: transposed im2col (pure layout plumbing, bf16)
# ---------------------------------------------------------------------------
def _im2col_T(x, kh, kw, pad, pool):
    """Transposed im2col on a channel-major activation.

    x: (C, N, H, W).  Returns (colsT_or_quads, (h_out, w_out), m_real, tile_m);
    colsT is a zero-padded (K_pad, M_pad) matrix in MXU_DTYPE (or a list of the 4
    pool-quadrant matrices when pool=True).  Rows ordered (c, i, j) to match torch
    weight.reshape(Cout, C*kh*kw); columns ordered (n, h, w).
    """
    c, n, h, w = x.shape
    if pad:
        x = jnp.pad(x, ((0, 0), (0, 0), (pad, pad), (pad, pad)))
    ho = h + 2 * pad - kh + 1
    wo = w + 2 * pad - kw + 1
    k = c * kh * kw
    kp = _round_up(k, 16)                                    # bf16 sublane packing
    patches = [x[ci, :, i:i + ho, j:j + wo]
               for ci in range(c) for i in range(kh) for j in range(kw)]
    cols = jnp.stack(patches, axis=0)                        # (K, N, Ho, Wo)

    def finish(a, mp):                                       # (K,N,h',w') -> (Kp, Mp)
        m = a.shape[1] * a.shape[2] * a.shape[3]
        a = a.reshape(k, m).astype(MXU_DTYPE)
        return jnp.pad(a, ((0, kp - k), (0, mp - m)))

    if pool:
        hp, wp = ho // 2, wo // 2
        m = n * hp * wp
        tm, mp = _tile_and_pad_m(m)
        quads = [finish(cols[:, :, dh::2, dw::2], mp) for dh in (0, 1) for dw in (0, 1)]
        return quads, (hp, wp), m, tm
    m = n * ho * wo
    tm, mp = _tile_and_pad_m(m)
    return finish(cols, mp), (ho, wo), m, tm


# ---------------------------------------------------------------------------
# Parameters
# ---------------------------------------------------------------------------
def init_params(key):
    keys = jax.random.split(key, 12)
    s = 0.1
    return {
        "c1w": jax.random.normal(keys[0], (6, 1, 5, 5), jnp.float32) * s,
        "c1b": jax.random.normal(keys[1], (6,), jnp.float32) * s,
        "c2w": jax.random.normal(keys[2], (6, 6, 4, 4), jnp.float32) * s,
        "c2b": jax.random.normal(keys[3], (6,), jnp.float32) * s,
        "c3w": jax.random.normal(keys[4], (16, 6, 4, 4), jnp.float32) * s,
        "c3b": jax.random.normal(keys[5], (16,), jnp.float32) * s,
        "l1w": jax.random.normal(keys[6], (120, 400), jnp.float32) * s,
        "l1b": jax.random.normal(keys[7], (120,), jnp.float32) * s,
        "l2w": jax.random.normal(keys[8], (84, 120), jnp.float32) * s,
        "l2b": jax.random.normal(keys[9], (84,), jnp.float32) * s,
        "l3w": jax.random.normal(keys[10], (10, 84), jnp.float32) * s,
        "l3b": jax.random.normal(keys[11], (10,), jnp.float32) * s,
    }


def prepare_params(p):
    """One-time relayout of PyTorch-style parameters for the kernels (hoisted):
    Cout padded to 8, K padded to 16 (bf16 sublanes), FC dims lane-padded, bf16 cast."""
    def conv_w(w):
        cout = w.shape[0]
        k = w.shape[1] * w.shape[2] * w.shape[3]
        cout_p = _round_up(cout, 8)
        kp = _round_up(k, 16)
        wm = jnp.pad(w.reshape(cout, k), ((0, cout_p - cout), (0, kp - k)))
        return wm.astype(MXU_DTYPE)

    def conv_b(b):
        cout_p = _round_up(b.shape[0], 8)
        return jnp.pad(b, (0, cout_p - b.shape[0])).reshape(-1, 1).astype(jnp.float32)

    def fc_w(w, kp, fp):                                     # torch (out,in) -> (in_p,out_p)
        out_f, in_f = w.shape
        wt = jnp.pad(w.T, ((0, kp - in_f), (0, fp - out_f)))
        return wt.astype(MXU_DTYPE)

    def fc_b(b, fp):
        return jnp.pad(b, (0, fp - b.shape[0])).reshape(1, -1).astype(jnp.float32)

    return {
        "c1w": conv_w(p["c1w"]), "c1b": conv_b(p["c1b"]),
        "c2w": conv_w(p["c2w"]), "c2b": conv_b(p["c2b"]),
        "c3w": conv_w(p["c3w"]), "c3b": conv_b(p["c3b"]),
        "l1w": fc_w(p["l1w"], 512, 128), "l1b": fc_b(p["l1b"], 128),
        "l2w": fc_w(p["l2w"], 128, 128), "l2b": fc_b(p["l2b"], 128),
        "l3w": fc_w(p["l3w"], 128, 128), "l3b": fc_b(p["l3b"], 128),
    }


# ---------------------------------------------------------------------------
# Forward pass (PyTorch CustomNet semantics)
# ---------------------------------------------------------------------------
def custom_net_forward(prep, x):
    """x: (N, 1, 28, 28) NCHW, like the PyTorch module.  Returns (N, 10) f32."""
    n = x.shape[0]
    xc = jnp.transpose(x, (1, 0, 2, 3)).astype(MXU_DTYPE)    # channel-major (C, N, H, W)

    # conv1 (1->6, k=5, pad=2) + ReLU + maxpool2  -> (6, N, 14, 14)
    cols, (hp, wp), m, tm = _im2col_T(xc, 5, 5, 2, pool=True)
    y = _conv_matmul(prep["c1w"], prep["c1b"], cols, tm, pool=True)
    a = y[:6, :m].reshape(6, n, hp, wp)                      # drop Cout pad + M pad

    # conv2 (6->6, k=4, pad=1) + ReLU              -> (6, N, 13, 13)
    cols, (ho, wo), m, tm = _im2col_T(a, 4, 4, 1, pool=False)
    y = _conv_matmul(prep["c2w"], prep["c2b"], cols, tm, pool=False)
    a = y[:6, :m].reshape(6, n, ho, wo)

    # conv3 (6->16, k=4, pad=0) + ReLU + maxpool2  -> (16, N, 5, 5)
    cols, (hp, wp), m, tm = _im2col_T(a, 4, 4, 0, pool=True)
    y = _conv_matmul(prep["c3w"], prep["c3b"], cols, tm, pool=True)
    a = y[:16, :m].reshape(16, n, hp, wp)

    # torch .view(-1, 16*5*5): per-image flatten in (c, h, w) order; pad K to 512
    feats = jnp.transpose(a, (1, 0, 2, 3)).reshape(n, 16 * hp * wp)
    feats = jnp.pad(feats, ((0, 0), (0, 512 - 16 * hp * wp)))

    # fc1 -> fc2 -> fc3 (no activations), fused + tiled over N
    return _linear_head(feats, prep["l1w"], prep["l1b"],
                        prep["l2w"], prep["l2b"],
                        prep["l3w"], prep["l3b"], n_out=10)


if __name__ == "__main__":
    key = jax.random.PRNGKey(0)
    pkey, xkey = jax.random.split(key)
    params = init_params(pkey)
    prep = prepare_params(params)                 # one-time weight relayout (hoisted)
    # Input implied by the 16*5*5 flatten: 1-channel 28x28 images. batch=2.
    x = jax.random.normal(xkey, (2, 1, 28, 28), jnp.float32)

    fwd = jax.jit(custom_net_forward)
    out = jax.block_until_ready(fwd(prep, x))
    assert out.shape == (2, 10), out.shape
    print("KERNEL_OK")
</pallas_src>

<mosaic_0001>
module attributes {stable_mosaic.version = 11 : i64} {
  func.func @_conv_pool_kernel(%arg0: i32, %arg1: memref<8x32xbf16, #tpu.memory_space<vmem>>, %arg2: memref<8x1xf32, #tpu.memory_space<vmem>>, %arg3: memref<32x256xbf16, #tpu.memory_space<vmem>>, %arg4: memref<32x256xbf16, #tpu.memory_space<vmem>>, %arg5: memref<32x256xbf16, #tpu.memory_space<vmem>>, %arg6: memref<32x256xbf16, #tpu.memory_space<vmem>>, %arg7: memref<8x256xbf16, #tpu.memory_space<vmem>>) attributes {dimension_semantics = [#tpu.dimension_semantics<parallel>], iteration_bounds = array<i64: 2>, scalar_prefetch = 0 : i64, scratch_operands = 0 : i64, tpu.core_type = #tpu.core_type<tc>, window_params = [{pipeline_mode = #tpu.pipeline_mode<synchronous>, transform_indices = @transform_0, window_bounds = array<i64: 8, 32>}, {pipeline_mode = #tpu.pipeline_mode<synchronous>, transform_indices = @transform_1, window_bounds = array<i64: 8, 1>}, {transform_indices = @transform_2, window_bounds = array<i64: 32, 256>}, {transform_indices = @transform_3, window_bounds = array<i64: 32, 256>}, {transform_indices = @transform_4, window_bounds = array<i64: 32, 256>}, {transform_indices = @transform_5, window_bounds = array<i64: 32, 256>}, {transform_indices = @transform_6, window_bounds = array<i64: 8, 256>}]} {
    %c0 = arith.constant 0 : index
    %c0_0 = arith.constant 0 : index
    %0 = vector.load %arg1[%c0, %c0_0] : memref<8x32xbf16, #tpu.memory_space<vmem>>, vector<8x32xbf16>
    %c0_1 = arith.constant 0 : index
    %c0_2 = arith.constant 0 : index
    %1 = vector.load %arg3[%c0_1, %c0_2] : memref<32x256xbf16, #tpu.memory_space<vmem>>, vector<32x256xbf16>
    %cst = arith.constant dense<0.000000e+00> : vector<8x256xf32>
    %2 = tpu.matmul %0, %1, %cst {dimension_numbers = #tpu.dot_dimension_numbers<[1], [0], [0], [1], [0, 0, 1, 1], [], []>} : vector<8x32xbf16>, vector<32x256xbf16>, vector<8x256xf32> -> vector<8x256xf32>
    %c0_3 = arith.constant 0 : index
    %c0_4 = arith.constant 0 : index
    %3 = vector.load %arg4[%c0_3, %c0_4] : memref<32x256xbf16, #tpu.memory_space<vmem>>, vector<32x256xbf16>
    %cst_5 = arith.constant dense<0.000000e+00> : vector<8x256xf32>
    %4 = tpu.matmul %0, %3, %cst_5 {dimension_numbers = #tpu.dot_dimension_numbers<[1], [0], [0], [1], [0, 0, 1, 1], [], []>} : vector<8x32xbf16>, vector<32x256xbf16>, vector<8x256xf32> -> vector<8x256xf32>
    %5 = arith.maximumf %2, %4 : vector<8x256xf32>
    %c0_6 = arith.constant 0 : index
    %c0_7 = arith.constant 0 : index
    %6 = vector.load %arg5[%c0_6, %c0_7] : memref<32x256xbf16, #tpu.memory_space<vmem>>, vector<32x256xbf16>
    %cst_8 = arith.constant dense<0.000000e+00> : vector<8x256xf32>
    %7 = tpu.matmul %0, %6, %cst_8 {dimension_numbers = #tpu.dot_dimension_numbers<[1], [0], [0], [1], [0, 0, 1, 1], [], []>} : vector<8x32xbf16>, vector<32x256xbf16>, vector<8x256xf32> -> vector<8x256xf32>
    %c0_9 = arith.constant 0 : index
    %c0_10 = arith.constant 0 : index
    %8 = vector.load %arg6[%c0_9, %c0_10] : memref<32x256xbf16, #tpu.memory_space<vmem>>, vector<32x256xbf16>
    %cst_11 = arith.constant dense<0.000000e+00> : vector<8x256xf32>
    %9 = tpu.matmul %0, %8, %cst_11 {dimension_numbers = #tpu.dot_dimension_numbers<[1], [0], [0], [1], [0, 0, 1, 1], [], []>} : vector<8x32xbf16>, vector<32x256xbf16>, vector<8x256xf32> -> vector<8x256xf32>
    %10 = arith.maximumf %7, %9 : vector<8x256xf32>
    %11 = arith.maximumf %5, %10 : vector<8x256xf32>
    %c0_12 = arith.constant 0 : index
    %c0_13 = arith.constant 0 : index
    %12 = vector.load %arg2[%c0_12, %c0_13] : memref<8x1xf32, #tpu.memory_space<vmem>>, vector<8x1xf32>
    %13 = vector.broadcast %12 : vector<8x1xf32> to vector<8x256xf32>
    %14 = arith.addf %11, %13 : vector<8x256xf32>
    %cst_14 = arith.constant 0.000000e+00 : f32
    %15 = vector.broadcast %cst_14 : f32 to vector<8x256xf32>
    %16 = arith.maximumf %14, %15 : vector<8x256xf32>
    %17 = arith.truncf %16 : vector<8x256xf32> to vector<8x256xbf16>
    %c0_15 = arith.constant 0 : index
    %c0_16 = arith.constant 0 : index
    %18 = vector.load %arg7[%c0_15, %c0_16] : memref<8x256xbf16, #tpu.memory_space<vmem>>, vector<8x256xbf16>
    tpu.vector_store %arg7[%c0_15, %c0_16], %17 {strides = array<i32>} : memref<8x256xbf16, #tpu.memory_space<vmem>>, vector<8x256xbf16>,
    return
  }
  func.func @transform_0(%arg0: i32) -> (i32, i32) {
    %c0_i32 = arith.constant 0 : i32
    %c0_i32_0 = arith.constant 0 : i32
    %c0_i32_1 = arith.constant 0 : i32
    return %c0_i32, %c0_i32_0 : i32, i32
  }
  func.func @transform_1(%arg0: i32) -> (i32, i32) {
    %c0_i32 = arith.constant 0 : i32
    %c0_i32_0 = arith.constant 0 : i32
    %c0_i32_1 = arith.constant 0 : i32
    return %c0_i32, %c0_i32_0 : i32, i32
  }
  func.func @transform_2(%arg0: i32) -> (i32, i32) {
    %c0_i32 = arith.constant 0 : i32
    %c0_i32_0 = arith.constant 0 : i32
    return %c0_i32, %arg0 : i32, i32
  }
  func.func @transform_3(%arg0: i32) -> (i32, i32) {
    %c0_i32 = arith.constant 0 : i32
    %c0_i32_0 = arith.constant 0 : i32
    return %c0_i32, %arg0 : i32, i32
  }
  func.func @transform_4(%arg0: i32) -> (i32, i32) {
    %c0_i32 = arith.constant 0 : i32
    %c0_i32_0 = arith.constant 0 : i32
    return %c0_i32, %arg0 : i32, i32
  }
  func.func @transform_5(%arg0: i32) -> (i32, i32) {
    %c0_i32 = arith.constant 0 : i32
    %c0_i32_0 = arith.constant 0 : i32
    return %c0_i32, %arg0 : i32, i32
  }
  func.func @transform_6(%arg0: i32) -> (i32, i32) {
    %c0_i32 = arith.constant 0 : i32
    %c0_i32_0 = arith.constant 0 : i32
    return %c0_i32, %arg0 : i32, i32
  }
}

module attributes {stable_mosaic.version = 11 : i64} {
  func.func @_conv_kernel(%arg0: i32, %arg1: memref<8x96xbf16, #tpu.memory_space<vmem>>, %arg2: memref<8x1xf32, #tpu.memory_space<vmem>>, %arg3: memref<96x256xbf16, #tpu.memory_space<vmem>>, %arg4: memref<8x256xbf16, #tpu.memory_space<vmem>>) attributes {dimension_semantics = [#tpu.dimension_semantics<parallel>], iteration_bounds = array<i64: 2>, scalar_prefetch = 0 : i64, scratch_operands = 0 : i64, tpu.core_type = #tpu.core_type<tc>, window_params = [{pipeline_mode = #tpu.pipeline_mode<synchronous>, transform_indices = @transform_0, window_bounds = array<i64: 8, 96>}, {pipeline_mode = #tpu.pipeline_mode<synchronous>, transform_indices = @transform_1, window_bounds = array<i64: 8, 1>}, {transform_indices = @transform_2, window_bounds = array<i64: 96, 256>}, {transform_indices = @transform_3, window_bounds = array<i64: 8, 256>}]} {
    %c0 = arith.constant 0 : index
    %c0_0 = arith.constant 0 : index
    %0 = vector.load %arg1[%c0, %c0_0] : memref<8x96xbf16, #tpu.memory_space<vmem>>, vector<8x96xbf16>
    %c0_1 = arith.constant 0 : index
    %c0_2 = arith.constant 0 : index
    %1 = vector.load %arg3[%c0_1, %c0_2] : memref<96x256xbf16, #tpu.memory_space<vmem>>, vector<96x256xbf16>
    %cst = arith.constant dense<0.000000e+00> : vector<8x256xf32>
    %2 = tpu.matmul %0, %1, %cst {dimension_numbers = #tpu.dot_dimension_numbers<[1], [0], [0], [1], [0, 0, 1, 1], [], []>} : vector<8x96xbf16>, vector<96x256xbf16>, vector<8x256xf32> -> vector<8x256xf32>
    %c0_3 = arith.constant 0 : index
    %c0_4 = arith.constant 0 : index
    %3 = vector.load %arg2[%c0_3, %c0_4] : memref<8x1xf32, #tpu.memory_space<vmem>>, vector<8x1xf32>
    %4 = vector.broadcast %3 : vector<8x1xf32> to vector<8x256xf32>
    %5 = arith.addf %2, %4 : vector<8x256xf32>
    %cst_5 = arith.constant 0.000000e+00 : f32
    %6 = vector.broadcast %cst_5 : f32 to vector<8x256xf32>
    %7 = arith.maximumf %5, %6 : vector<8x256xf32>
    %8 = arith.truncf %7 : vector<8x256xf32> to vector<8x256xbf16>
    %c0_6 = arith.constant 0 : index
    %c0_7 = arith.constant 0 : index
    %9 = vector.load %arg4[%c0_6, %c0_7] : memref<8x256xbf16, #tpu.memory_space<vmem>>, vector<8x256xbf16>
    tpu.vector_store %arg4[%c0_6, %c0_7], %8 {strides = array<i32>} : memref<8x256xbf16, #tpu.memory_space<vmem>>, vector<8x256xbf16>,
    return
  }
  func.func @transform_0(%arg0: i32) -> (i32, i32) {
    %c0_i32 = arith.constant 0 : i32
    %c0_i32_0 = arith.constant 0 : i32
    %c0_i32_1 = arith.constant 0 : i32
    return %c0_i32, %c0_i32_0 : i32, i32
  }
  func.func @transform_1(%arg0: i32) -> (i32, i32) {
    %c0_i32 = arith.constant 0 : i32
    %c0_i32_0 = arith.constant 0 : i32
    %c0_i32_1 = arith.constant 0 : i32
    return %c0_i32, %c0_i32_0 : i32, i32
  }
  func.func @transform_2(%arg0: i32) -> (i32, i32) {
    %c0_i32 = arith.constant 0 : i32
    %c0_i32_0 = arith.constant 0 : i32
    return %c0_i32, %arg0 : i32, i32
  }
  func.func @transform_3(%arg0: i32) -> (i32, i32) {
    %c0_i32 = arith.constant 0 : i32
    %c0_i32_0 = arith.constant 0 : i32
    return %c0_i32, %arg0 : i32, i32
  }
}

module attributes {stable_mosaic.version = 11 : i64} {
  func.func @_conv_pool_kernel(%arg0: i32, %arg1: memref<16x96xbf16, #tpu.memory_space<vmem>>, %arg2: memref<16x1xf32, #tpu.memory_space<vmem>>, %arg3: memref<96x128xbf16, #tpu.memory_space<vmem>>, %arg4: memref<96x128xbf16, #tpu.memory_space<vmem>>, %arg5: memref<96x128xbf16, #tpu.memory_space<vmem>>, %arg6: memref<96x128xbf16, #tpu.memory_space<vmem>>, %arg7: memref<16x128xbf16, #tpu.memory_space<vmem>>) attributes {dimension_semantics = [#tpu.dimension_semantics<parallel>], iteration_bounds = array<i64: 1>, scalar_prefetch = 0 : i64, scratch_operands = 0 : i64, tpu.core_type = #tpu.core_type<tc>, window_params = [{pipeline_mode = #tpu.pipeline_mode<synchronous>, transform_indices = @transform_0, window_bounds = array<i64: 16, 96>}, {pipeline_mode = #tpu.pipeline_mode<synchronous>, transform_indices = @transform_1, window_bounds = array<i64: 16, 1>}, {transform_indices = @transform_2, window_bounds = array<i64: 96, 128>}, {transform_indices = @transform_3, window_bounds = array<i64: 96, 128>}, {transform_indices = @transform_4, window_bounds = array<i64: 96, 128>}, {transform_indices = @transform_5, window_bounds = array<i64: 96, 128>}, {transform_indices = @transform_6, window_bounds = array<i64: 16, 128>}]} {
    %c0 = arith.constant 0 : index
    %c0_0 = arith.constant 0 : index
    %0 = vector.load %arg1[%c0, %c0_0] : memref<16x96xbf16, #tpu.memory_space<vmem>>, vector<16x96xbf16>
    %c0_1 = arith.constant 0 : index
    %c0_2 = arith.constant 0 : index
    %1 = vector.load %arg3[%c0_1, %c0_2] : memref<96x128xbf16, #tpu.memory_space<vmem>>, vector<96x128xbf16>
    %cst = arith.constant dense<0.000000e+00> : vector<16x128xf32>
    %2 = tpu.matmul %0, %1, %cst {dimension_numbers = #tpu.dot_dimension_numbers<[1], [0], [0], [1], [0, 0, 1, 1], [], []>} : vector<16x96xbf16>, vector<96x128xbf16>, vector<16x128xf32> -> vector<16x128xf32>
    %c0_3 = arith.constant 0 : index
    %c0_4 = arith.constant 0 : index
    %3 = vector.load %arg4[%c0_3, %c0_4] : memref<96x128xbf16, #tpu.memory_space<vmem>>, vector<96x128xbf16>
    %cst_5 = arith.constant dense<0.000000e+00> : vector<16x128xf32>
    %4 = tpu.matmul %0, %3, %cst_5 {dimension_numbers = #tpu.dot_dimension_numbers<[1], [0], [0], [1], [0, 0, 1, 1], [], []>} : vector<16x96xbf16>, vector<96x128xbf16>, vector<16x128xf32> -> vector<16x128xf32>
    %5 = arith.maximumf %2, %4 : vector<16x128xf32>
    %c0_6 = arith.constant 0 : index
    %c0_7 = arith.constant 0 : index
    %6 = vector.load %arg5[%c0_6, %c0_7] : memref<96x128xbf16, #tpu.memory_space<vmem>>, vector<96x128xbf16>
    %cst_8 = arith.constant dense<0.000000e+00> : vector<16x128xf32>
    %7 = tpu.matmul %0, %6, %cst_8 {dimension_numbers = #tpu.dot_dimension_numbers<[1], [0], [0], [1], [0, 0, 1, 1], [], []>} : vector<16x96xbf16>, vector<96x128xbf16>, vector<16x128xf32> -> vector<16x128xf32>
    %c0_9 = arith.constant 0 : index
    %c0_10 = arith.constant 0 : index
    %8 = vector.load %arg6[%c0_9, %c0_10] : memref<96x128xbf16, #tpu.memory_space<vmem>>, vector<96x128xbf16>
    %cst_11 = arith.constant dense<0.000000e+00> : vector<16x128xf32>
    %9 = tpu.matmul %0, %8, %cst_11 {dimension_numbers = #tpu.dot_dimension_numbers<[1], [0], [0], [1], [0, 0, 1, 1], [], []>} : vector<16x96xbf16>, vector<96x128xbf16>, vector<16x128xf32> -> vector<16x128xf32>
    %10 = arith.maximumf %7, %9 : vector<16x128xf32>
    %11 = arith.maximumf %5, %10 : vector<16x128xf32>
    %c0_12 = arith.constant 0 : index
    %c0_13 = arith.constant 0 : index
    %12 = vector.load %arg2[%c0_12, %c0_13] : memref<16x1xf32, #tpu.memory_space<vmem>>, vector<16x1xf32>
    %13 = vector.broadcast %12 : vector<16x1xf32> to vector<16x128xf32>
    %14 = arith.addf %11, %13 : vector<16x128xf32>
    %cst_14 = arith.constant 0.000000e+00 : f32
    %15 = vector.broadcast %cst_14 : f32 to vector<16x128xf32>
    %16 = arith.maximumf %14, %15 : vector<16x128xf32>
    %17 = arith.truncf %16 : vector<16x128xf32> to vector<16x128xbf16>
    %c0_15 = arith.constant 0 : index
    %c0_16 = arith.constant 0 : index
    %18 = vector.load %arg7[%c0_15, %c0_16] : memref<16x128xbf16, #tpu.memory_space<vmem>>, vector<16x128xbf16>
    tpu.vector_store %arg7[%c0_15, %c0_16], %17 {strides = array<i32>} : memref<16x128xbf16, #tpu.memory_space<vmem>>, vector<16x128xbf16>,
    return
  }
  func.func @transform_0(%arg0: i32) -> (i32, i32) {
    %c0_i32 = arith.constant 0 : i32
    %c0_i32_0 = arith.constant 0 : i32
    %c0_i32_1 = arith.constant 0 : i32
    return %c0_i32, %c0_i32_0 : i32, i32
  }
  func.func @transform_1(%arg0: i32) -> (i32, i32) {
    %c0_i32 = arith.constant 0 : i32
    %c0_i32_0 = arith.constant 0 : i32
    %c0_i32_1 = arith.constant 0 : i32
    return %c0_i32, %c0_i32_0 : i32, i32
  }
  func.func @transform_2(%arg0: i32) -> (i32, i32) {
    %c0_i32 = arith.constant 0 : i32
    %c0_i32_0 = arith.constant 0 : i32
    return %c0_i32, %arg0 : i32, i32
  }
  func.func @transform_3(%arg0: i32) -> (i32, i32) {
    %c0_i32 = arith.constant 0 : i32
    %c0_i32_0 = arith.constant 0 : i32
    return %c0_i32, %arg0 : i32, i32
  }
  func.func @transform_4(%arg0: i32) -> (i32, i32) {
    %c0_i32 = arith.constant 0 : i32
    %c0_i32_0 = arith.constant 0 : i32
    return %c0_i32, %arg0 : i32, i32
  }
  func.func @transform_5(%arg0: i32) -> (i32, i32) {
    %c0_i32 = arith.constant 0 : i32
    %c0_i32_0 = arith.constant 0 : i32
    return %c0_i32, %arg0 : i32, i32
  }
  func.func @transform_6(%arg0: i32) -> (i32, i32) {
    %c0_i32 = arith.constant 0 : i32
    %c0_i32_0 = arith.constant 0 : i32
    return %c0_i32, %arg0 : i32, i32
  }
}

module attributes {stable_mosaic.version = 11 : i64} {
  func.func @_head_kernel(%arg0: i32, %arg1: memref<8x512xbf16, #tpu.memory_space<vmem>>, %arg2: memref<512x128xbf16, #tpu.memory_space<vmem>>, %arg3: memref<1x128xf32, #tpu.memory_space<vmem>>, %arg4: memref<128x128xbf16, #tpu.memory_space<vmem>>, %arg5: memref<1x128xf32, #tpu.memory_space<vmem>>, %arg6: memref<128x128xbf16, #tpu.memory_space<vmem>>, %arg7: memref<1x128xf32, #tpu.memory_space<vmem>>, %arg8: memref<8x128xf32, #tpu.memory_space<vmem>>) attributes {dimension_semantics = [#tpu.dimension_semantics<parallel>], iteration_bounds = array<i64: 1>, scalar_prefetch = 0 : i64, scratch_operands = 0 : i64, tpu.core_type = #tpu.core_type<tc>, window_params = [{transform_indices = @transform_0, window_bounds = array<i64: 8, 512>}, {pipeline_mode = #tpu.pipeline_mode<synchronous>, transform_indices = @transform_1, window_bounds = array<i64: 512, 128>}, {pipeline_mode = #tpu.pipeline_mode<synchronous>, transform_indices = @transform_2, window_bounds = array<i64: 1, 128>}, {pipeline_mode = #tpu.pipeline_mode<synchronous>, transform_indices = @transform_3, window_bounds = array<i64: 128, 128>}, {pipeline_mode = #tpu.pipeline_mode<synchronous>, transform_indices = @transform_4, window_bounds = array<i64: 1, 128>}, {pipeline_mode = #tpu.pipeline_mode<synchronous>, transform_indices = @transform_5, window_bounds = array<i64: 128, 128>}, {pipeline_mode = #tpu.pipeline_mode<synchronous>, transform_indices = @transform_6, window_bounds = array<i64: 1, 128>}, {transform_indices = @transform_7, window_bounds = array<i64: 8, 128>}]} {
    %c0 = arith.constant 0 : index
    %c0_0 = arith.constant 0 : index
    %0 = vector.load %arg1[%c0, %c0_0] : memref<8x512xbf16, #tpu.memory_space<vmem>>, vector<8x512xbf16>
    %c0_1 = arith.constant 0 : index
    %c0_2 = arith.constant 0 : index
    %1 = vector.load %arg2[%c0_1, %c0_2] : memref<512x128xbf16, #tpu.memory_space<vmem>>, vector<512x128xbf16>
    %cst = arith.constant dense<0.000000e+00> : vector<8x128xf32>
    %2 = tpu.matmul %0, %1, %cst {dimension_numbers = #tpu.dot_dimension_numbers<[1], [0], [0], [1], [0, 0, 1, 1], [], []>} : vector<8x512xbf16>, vector<512x128xbf16>, vector<8x128xf32> -> vector<8x128xf32>
    %c0_3 = arith.constant 0 : index
    %c0_4 = arith.constant 0 : index
    %3 = vector.load %arg3[%c0_3, %c0_4] : memref<1x128xf32, #tpu.memory_space<vmem>>, vector<1x128xf32>
    %4 = vector.broadcast %3 : vector<1x128xf32> to vector<8x128xf32>
    %5 = arith.addf %2, %4 : vector<8x128xf32>
    %6 = arith.truncf %5 : vector<8x128xf32> to vector<8x128xbf16>
    %c0_5 = arith.constant 0 : index
    %c0_6 = arith.constant 0 : index
    %7 = vector.load %arg4[%c0_5, %c0_6] : memref<128x128xbf16, #tpu.memory_space<vmem>>, vector<128x128xbf16>
    %cst_7 = arith.constant dense<0.000000e+00> : vector<8x128xf32>
    %8 = tpu.matmul %6, %7, %cst_7 {dimension_numbers = #tpu.dot_dimension_numbers<[1], [0], [0], [1], [0, 0, 1, 1], [], []>} : vector<8x128xbf16>, vector<128x128xbf16>, vector<8x128xf32> -> vector<8x128xf32>
    %c0_8 = arith.constant 0 : index
    %c0_9 = arith.constant 0 : index
    %9 = vector.load %arg5[%c0_8, %c0_9] : memref<1x128xf32, #tpu.memory_space<vmem>>, vector<1x128xf32>
    %10 = vector.broadcast %9 : vector<1x128xf32> to vector<8x128xf32>
    %11 = arith.addf %8, %10 : vector<8x128xf32>
    %12 = arith.truncf %11 : vector<8x128xf32> to vector<8x128xbf16>
    %c0_10 = arith.constant 0 : index
    %c0_11 = arith.constant 0 : index
    %13 = vector.load %arg6[%c0_10, %c0_11] : memref<128x128xbf16, #tpu.memory_space<vmem>>, vector<128x128xbf16>
    %cst_12 = arith.constant dense<0.000000e+00> : vector<8x128xf32>
    %14 = tpu.matmul %12, %13, %cst_12 {dimension_numbers = #tpu.dot_dimension_numbers<[1], [0], [0], [1], [0, 0, 1, 1], [], []>} : vector<8x128xbf16>, vector<128x128xbf16>, vector<8x128xf32> -> vector<8x128xf32>
    %c0_13 = arith.constant 0 : index
    %c0_14 = arith.constant 0 : index
    %15 = vector.load %arg7[%c0_13, %c0_14] : memref<1x128xf32, #tpu.memory_space<vmem>>, vector<1x128xf32>
    %16 = vector.broadcast %15 : vector<1x128xf32> to vector<8x128xf32>
    %17 = arith.addf %14, %16 : vector<8x128xf32>
    %c0_15 = arith.constant 0 : index
    %c0_16 = arith.constant 0 : index
    %18 = vector.load %arg8[%c0_15, %c0_16] : memref<8x128xf32, #tpu.memory_space<vmem>>, vector<8x128xf32>
    tpu.vector_store %arg8[%c0_15, %c0_16], %17 {strides = array<i32>} : memref<8x128xf32, #tpu.memory_space<vmem>>, vector<8x128xf32>,
    return
  }
  func.func @transform_0(%arg0: i32) -> (i32, i32) {
    %c0_i32 = arith.constant 0 : i32
    %c0_i32_0 = arith.constant 0 : i32
    return %arg0, %c0_i32 : i32, i32
  }
  func.func @transform_1(%arg0: i32) -> (i32, i32) {
    %c0_i32 = arith.constant 0 : i32
    %c0_i32_0 = arith.constant 0 : i32
    %c0_i32_1 = arith.constant 0 : i32
    return %c0_i32, %c0_i32_0 : i32, i32
  }
  func.func @transform_2(%arg0: i32) -> (i32, i32) {
    %c0_i32 = arith.constant 0 : i32
    %c0_i32_0 = arith.constant 0 : i32
    %c0_i32_1 = arith.constant 0 : i32
    return %c0_i32, %c0_i32_0 : i32, i32
  }
  func.func @transform_3(%arg0: i32) -> (i32, i32) {
    %c0_i32 = arith.constant 0 : i32
    %c0_i32_0 = arith.constant 0 : i32
    %c0_i32_1 = arith.constant 0 : i32
    return %c0_i32, %c0_i32_0 : i32, i32
  }
  func.func @transform_4(%arg0: i32) -> (i32, i32) {
    %c0_i32 = arith.constant 0 : i32
    %c0_i32_0 = arith.constant 0 : i32
    %c0_i32_1 = arith.constant 0 : i32
    return %c0_i32, %c0_i32_0 : i32, i32
  }
  func.func @transform_5(%arg0: i32) -> (i32, i32) {
    %c0_i32 = arith.constant 0 : i32
    %c0_i32_0 = arith.constant 0 : i32
    %c0_i32_1 = arith.constant 0 : i32
    return %c0_i32, %c0_i32_0 : i32, i32
  }
  func.func @transform_6(%arg0: i32) -> (i32, i32) {
    %c0_i32 = arith.constant 0 : i32
    %c0_i32_0 = arith.constant 0 : i32
    %c0_i32_1 = arith.constant 0 : i32
    return %c0_i32, %c0_i32_0 : i32, i32
  }
  func.func @transform_7(%arg0: i32) -> (i32, i32) {
    %c0_i32 = arith.constant 0 : i32
    %c0_i32_0 = arith.constant 0 : i32
    return %arg0, %c0_i32 : i32, i32
  }
}

</mosaic_0001>

<bundles_post_ra>
// kernel: custom_net_forward.4
= control target key start
LH: loop header
LB: loop body
LE: loop exit
PB: predicated region body
PF: predicated region fallthrough
CT: control target
= control target key end

     0   :  { %s1073_s21 = smov 0   ;;  %s1075_s22 = smov 0   ;;  %s1162_s0 = inlined_call_operand.vmem [shape: bf16[8,32], index: 0, kind: input, shape index: {}]   ;;  %s1163_s1 = inlined_call_operand.vmem [shape: f32[8,1], index: 1, kind: input, shape index: {}]   ;;  %s1164_s2 = inlined_call_operand.vmem [shape: bf16[32,512], index: 2, kind: input, shape index: {}]   ;;  %s1165_s3 = inlined_call_operand.vmem [shape: bf16[32,512], index: 3, kind: input, shape index: {}]   ;;  %s1166_s4 = inlined_call_operand.vmem [shape: bf16[32,512], index: 4, kind: input, shape index: {}]   ;;  %s1167_s5 = inlined_call_operand.vmem [shape: bf16[32,512], index: 5, kind: input, shape index: {}]   ;;  %s1168_s6 = inlined_call_operand.vmem [shape: bf16[8,512], index: 6, kind: output, shape index: {}]  }
   0x1   :  { %s1077_s23 = smov 0  }
   0x2 LB: > { %s912_s24 = sadd.s32 4294967295, %s1035_s23   ;;  %s1090_s25 = sadd.s32 1, %s1035_s23   ;;  %s1035_s23 = sphi %s1077_s23, %s1172_s23   ;;  %s1031_s22 = sphi %s1075_s22, %s1171_s22   ;;  %s1027_s21 = sphi %s1073_s21, %s1170_s21  }
   0x3   : > { %s62_s26 = ssub.s32 %s1035_s23, %s1090_s25  ;;  %s65_s27 = sadd.s32 1, %s1031_s22 }
   0x4   : > { %p63_p0 = scmp.eq.s32.totalorder %s62_s26, 0  ;;  %p72_p1 = scmp.ne.s32.totalorder %s1031_s22, %s1027_s21 }
   0x5   : > { %p73_p2 = scmp.eq.s32.totalorder %s1035_s23, 0  ;;  %p915_p4 = scmp.ge.s32.totalorder %s1035_s23, 2 }
   0x6   : > { %s1099_s28 = scalar_select %p63_p0, %s1031_s22, %s65_s27  }
   0x7   : > { %p1101_p3 = por %p73_p2, %p72_p1  ;;  %208 = sbr.rel (%p915_p4) target bundleno = 42 (0x2a), region = 24 }
   0xe   : > { %211 = sbr.rel (!%p1101_p3) target bundleno = 21 (0x15), region = 28  ;;  %s213_s30 = sand.u32 (%p1101_p3), 1, %s1031_s22  }
   0xf   : > { %s958_s7 = sshll.u32 (%p1101_p3), %s1035_s23, 3  ;;  %s916_s8 = sshll.u32 (%p1101_p3), %s213_s30, 5 }
  0x10   : > { %s218_s11 = scalar_lea.vmem (%p1101_p3), %s1164_s2, %s958_s7  ;;  %s215_s12 = scalar_lea.vmem (%p1101_p3), [#allocation2], %s916_s8 }
  0x11   : > { %v252_v0 = vld [vmem:[%s218_s11] sm:$0xff] (%p1101_p3)  ;;  %v254_v1 = vld [vmem:[%s218_s11 + $0x10] sm:$0xff] (%p1101_p3) }
  0x12   : > { %v256_v2 = vld [vmem:[%s218_s11 + $0x20] sm:$0xff] (%p1101_p3)  ;;  %253 = vst [vmem:[%s215_s12] sm:$0xff] (%p1101_p3), %v252_v0  ;;  %255 = vst [vmem:[%s215_s12 + $0x8] sm:$0xff] (%p1101_p3), %v254_v1  ;;  %v258_v3 = vld [vmem:[%s218_s11 + $0x30] sm:$0xff] (%p1101_p3) }
  0x13   : > { %257 = vst [vmem:[%s215_s12 + $0x10] sm:$0xff] (%p1101_p3), %v256_v2  ;;  %259 = vst [vmem:[%s215_s12 + $0x18] sm:$0xff] (%p1101_p3), %v258_v3 }
  0x15 PF: > { %265 = sbr.rel (!%p1101_p3) target bundleno = 28 (0x1c), region = 66  ;;  %s267_s13 = sand.u32 (%p1101_p3), 1, %s1031_s22  }
  0x16   : > { %s959_s14 = sshll.u32 (%p1101_p3), %s1035_s23, 3  ;;  %s919_s15 = sshll.u32 (%p1101_p3), %s267_s13, 5 }
  0x17   : > { %s272_s18 = scalar_lea.vmem (%p1101_p3), %s1165_s3, %s959_s14  ;;  %s269_s19 = scalar_lea.vmem (%p1101_p3), [#allocation3], %s919_s15 }
  0x18   : > { %v306_v4 = vld [vmem:[%s272_s18] sm:$0xff] (%p1101_p3)  ;;  %v308_v5 = vld [vmem:[%s272_s18 + $0x10] sm:$0xff] (%p1101_p3) }
  0x19   : > { %v310_v6 = vld [vmem:[%s272_s18 + $0x20] sm:$0xff] (%p1101_p3)  ;;  %307 = vst [vmem:[%s269_s19] sm:$0xff] (%p1101_p3), %v306_v4  ;;  %309 = vst [vmem:[%s269_s19 + $0x8] sm:$0xff] (%p1101_p3), %v308_v5  ;;  %v312_v7 = vld [vmem:[%s272_s18 + $0x30] sm:$0xff] (%p1101_p3) }
  0x1a   : > { %311 = vst [vmem:[%s269_s19 + $0x10] sm:$0xff] (%p1101_p3), %v310_v6  ;;  %313 = vst [vmem:[%s269_s19 + $0x18] sm:$0xff] (%p1101_p3), %v312_v7 }
  0x1c PF: > { %319 = sbr.rel (!%p1101_p3) target bundleno = 35 (0x23), region = 104  ;;  %s321_s20 = sand.u32 (%p1101_p3), 1, %s1031_s22  }
  0x1d   : > { %s960_s26 = sshll.u32 (%p1101_p3), %s1035_s23, 3  ;;  %s922_s27 = sshll.u32 (%p1101_p3), %s321_s20, 5 }
  0x1e   : > { %s326_s8 = scalar_lea.vmem (%p1101_p3), %s1166_s4, %s960_s26  ;;  %s323_s9 = scalar_lea.vmem (%p1101_p3), [#allocation4], %s922_s27 }
  0x1f   : > { %v360_v8 = vld [vmem:[%s326_s8] sm:$0xff] (%p1101_p3)  ;;  %v362_v9 = vld [vmem:[%s326_s8 + $0x10] sm:$0xff] (%p1101_p3) }
  0x20   : > { %v364_v10 = vld [vmem:[%s326_s8 + $0x20] sm:$0xff] (%p1101_p3)  ;;  %361 = vst [vmem:[%s323_s9] sm:$0xff] (%p1101_p3), %v360_v8  ;;  %363 = vst [vmem:[%s323_s9 + $0x8] sm:$0xff] (%p1101_p3), %v362_v9  ;;  %v366_v11 = vld [vmem:[%s326_s8 + $0x30] sm:$0xff] (%p1101_p3) }
  0x21   : > { %365 = vst [vmem:[%s323_s9 + $0x10] sm:$0xff] (%p1101_p3), %v364_v10  ;;  %367 = vst [vmem:[%s323_s9 + $0x18] sm:$0xff] (%p1101_p3), %v366_v11 }
  0x23 PF: > { %373 = sbr.rel (!%p1101_p3) target bundleno = 42 (0x2a), region = 142  ;;  %s375_s10 = sand.u32 (%p1101_p3), 1, %s1031_s22  }
  0x24   : > { %s961_s11 = sshll.u32 (%p1101_p3), %s1035_s23, 3  ;;  %s925_s12 = sshll.u32 (%p1101_p3), %s375_s10, 5 }
  0x25   : > { %s380_s15 = scalar_lea.vmem (%p1101_p3), %s1167_s5, %s961_s11  ;;  %s377_s16 = scalar_lea.vmem (%p1101_p3), [#allocation5], %s925_s12 }
  0x26   : > { %v414_v12 = vld [vmem:[%s380_s15] sm:$0xff] (%p1101_p3)  ;;  %v416_v13 = vld [vmem:[%s380_s15 + $0x10] sm:$0xff] (%p1101_p3) }
  0x27   : > { %v418_v14 = vld [vmem:[%s380_s15 + $0x20] sm:$0xff] (%p1101_p3)  ;;  %415 = vst [vmem:[%s377_s16] sm:$0xff] (%p1101_p3), %v414_v12  ;;  %417 = vst [vmem:[%s377_s16 + $0x8] sm:$0xff] (%p1101_p3), %v416_v13  ;;  %v420_v15 = vld [vmem:[%s380_s15 + $0x30] sm:$0xff] (%p1101_p3) }
  0x28   : > { %419 = vst [vmem:[%s377_s16 + $0x10] sm:$0xff] (%p1101_p3), %v418_v14  ;;  %421 = vst [vmem:[%s377_s16 + $0x18] sm:$0xff] (%p1101_p3), %v420_v15 }
  0x2a PF: > { %p928_p5 = scmp.ge.s32.totalorder %s1035_s23, 1  ;;  %p426_p6 = scmp.lt.s32.totalorder %s1035_s23, 3 }
  0x2c   : > { %p427_p7 = pnand %p928_p5, %p426_p6 }
  0x2d   : > { %s433_s29 = sand.u32 (!%p427_p7), 1, %s1027_s21   ;;  %v777_v16 = vld [vmem:[%s1163_s1] sm:$0xff] (!%p427_p7)  ;;  %v1037_v17 = vmov (!%p427_p7), 0   ;;  %vm531_vm0 = vcmask (!%p427_p7), 261120   ;;  %s933_s8 = sshll.u32 (!%p427_p7), %s912_s24, 1 }
  0x2e   : > { %430 = sbr.rel (%p427_p7) target bundleno = 290 (0x122), region = 180  ;;  %s929_s19 = sshll.u32 (!%p427_p7), %s433_s29, 5  ;;  %567 = vmatprep.mubr.bf16.mxu0 (!%p427_p7), %v1037_v17  ;;  %632 = vmatprep.mubr.bf16.mxu1 (!%p427_p7), %v1037_v17  ;;  %v506_v26 = vld [vmem:[%s1162_s0] sm:$0xf] (!%p427_p7) }
  0x2f   : > { %988 = vset.pattern.permute.xlu0 (!%p427_p7), %v1037_v17  ;;  %s435_s20 = scalar_lea.vmem (!%p427_p7), [#allocation2], %s929_s19  ;;  %s442_s26 = scalar_lea.vmem (!%p427_p7), [#allocation3], %s929_s19 }
  0x30   : > { %v989_v18 = vld [vmem:[%s435_s20 + $0x4] ss:$8 sps:$4 sm:$0xff] (!%p427_p7)   ;;  %780 = vperm.xlu0 (!%p427_p7), %988, %v777_v16   ;;  %v993_v20 = vld [vmem:[%s435_s20] ss:$8 sps:$4 sm:$0xff] (!%p427_p7)   ;;  %v995_v22 = vld [vmem:[%s435_s20 + $0x14] ss:$8 sps:$4 sm:$0xff] (!%p427_p7)  }
  0x31   : > { %v991_v19 = vld [vmem:[%s442_s26 + $0x4] ss:$8 sps:$4 sm:$0xff] (!%p427_p7)   ;;  %535 = vmatprep.subr.bf16.mxu0 (!%p427_p7), %v989_v18  ;;  %v994_v21 = vld [vmem:[%s442_s26] ss:$8 sps:$4 sm:$0xff] (!%p427_p7)   ;;  %v997_v23 = vld [vmem:[%s442_s26 + $0x14] ss:$8 sps:$4 sm:$0xff] (!%p427_p7)  }
  0x32   : > { %600 = vmatprep.subr.bf16.mxu1 (!%p427_p7), %v991_v19  ;;  %536 = vmatpush1.bf16.msra.mxu0 (!%p427_p7), %v993_v20  ;;  %v999_v24 = vld [vmem:[%s435_s20 + $0x10] ss:$8 sps:$4 sm:$0xff] (!%p427_p7)   ;;  %s449_s21 = scalar_lea.vmem (!%p427_p7), [#allocation4], %s929_s19  ;;  %s456_s7 = scalar_lea.vmem (!%p427_p7), [#allocation5], %s929_s19 }
  0x33   : > { %601 = vmatpush1.bf16.msra.mxu1 (!%p427_p7), %v994_v21  ;;  %537 = vmatprep.subr.bf16.mxu0 (!%p427_p7), %v995_v22  ;;  %v1000_v25 = vld [vmem:[%s442_s26 + $0x10] ss:$8 sps:$4 sm:$0xff] (!%p427_p7)   ;;  %v1003_v27 = vld [vmem:[%s449_s21 + $0x4] ss:$8 sps:$4 sm:$0xff] (!%p427_p7)   ;;  %v1001_v28 = vld [vmem:[%s449_s21] ss:$8 sps:$4 sm:$0xff] (!%p427_p7)  }
  0x34   : > { %602 = vmatprep.subr.bf16.mxu1 (!%p427_p7), %v997_v23  ;;  %v1006_v29 = vld [vmem:[%s456_s7 + $0x4] ss:$8 sps:$4 sm:$0xff] (!%p427_p7)   ;;  %v1004_v30 = vld [vmem:[%s456_s7] ss:$8 sps:$4 sm:$0xff] (!%p427_p7)   ;;  %v1009_v31 = vld [vmem:[%s449_s21 + $0x14] ss:$8 sps:$4 sm:$0xff] (!%p427_p7)  }
  0x35   : > { %v1012_v32 = vld [vmem:[%s456_s7 + $0x14] ss:$8 sps:$4 sm:$0xff]   ;;  %v1007_v33 = vld [vmem:[%s449_s21 + $0x10] ss:$8 sps:$4 sm:$0xff]   ;;  %p500_p8 = scmp.lt.s32.totalorder %s933_s8, 3 }
  0x36   : > { %538 = vmatpush1.bf16.msra.mxu0 %v999_v24  ;;  %v1010_v34 = vld [vmem:[%s456_s7 + $0x10] ss:$8 sps:$4 sm:$0xff]  }
  0x37   : > { %603 = vmatpush1.bf16.msra.mxu1 %v1000_v25  ;;  %667 = vmatprep.subr.bf16.mxu0 %v1003_v27  ;;  %s1174_s8 = smov (!%p500_p8, %s933_s8), 3 }
  0x38   : > { %732 = vmatprep.subr.bf16.mxu1 %v1006_v29  ;;  %s934_s9 = sshll.u32 %s1174_s8, 2 }
  0x39   : > { %939 = vmatmul.mubr.msk.bf16.vlgmr.msra.gmra.mrb[0].mxu0 %vm531_vm0, %v506_v26  ;;  %s503_s10 = scalar_lea.vmem %s1168_s6, %s934_s9 }
  0x3a   : > { %944 = vmatmul.mubr.msk.bf16.vlgmr.msra.gmra.mrb[0].mxu1 %vm531_vm0, %v506_v26  ;;  %668 = vmatpush1.bf16.msra.mxu0 %v1001_v28 }
  0x3b   : > { %733 = vmatpush1.bf16.msra.mxu1 %v1004_v30  ;;  %669 = vmatprep.subr.bf16.mxu0 %v1009_v31 }
  0x3c   : > { %734 = vmatprep.subr.bf16.mxu1 %v1012_v32  ;;  %699 = vmatprep.mubr.bf16.mxu0 %v1037_v17 }
  0x3d   : > { %764 = vmatprep.mubr.bf16.mxu1 %v1037_v17 }
  0x3e   : > { %670 = vmatpush1.bf16.msra.mxu0 %v1007_v33 }
  0x3f   : > { %735 = vmatpush1.bf16.msra.mxu1 %v1010_v34 }
  0x41   : > { %949 = vmatmul.mubr.msk.bf16.vlgmr.msra.gmra.mrb[4].mxu0 %vm531_vm0, %v506_v26 }
  0x42   : > { %954 = vmatmul.mubr.msk.bf16.vlgmr.msra.gmra.mrb[4].mxu1 %vm531_vm0, %v506_v26 }
  0xaf   : > { %v781_v45 = vpop.permute.xlu0 %780 }
 0x10c   : > { %v569_v35 = vpop.f32.mrb[0].mxu0 }
 0x10d   : > { %v634_v36 = vpop.f32.mrb[0].mxu1  ;;  %v571_v38 = vpop.f32.mrb[1].mxu0 }
 0x10e   : > { %v641_v37 = vmax.f32 %v569_v35, %v634_v36  ;;  %v636_v39 = vpop.f32.mrb[1].mxu1  ;;  %v573_v41 = vpop.f32.mrb[2].mxu0 }
 0x10f   : > { %v642_v40 = vmax.f32 %v571_v38, %v636_v39  ;;  %v638_v42 = vpop.f32.mrb[2].mxu1  ;;  %v574_v43 = vpop.f32.mrb[3].mxu0 }
 0x110   : > { %v639_v44 = vpop.f32.mrb[3].mxu1 }
 0x114   : > { %v701_v46 = vpop.f32.mrb[4].mxu0 }
 0x115   : > { %v766_v47 = vpop.f32.mrb[4].mxu1  ;;  %v703_v49 = vpop.f32.mrb[5].mxu0 }
 0x116   : > { %v773_v48 = vmax.f32 %v701_v46, %v766_v47  ;;  %v768_v50 = vpop.f32.mrb[5].mxu1  ;;  %v705_v52 = vpop.f32.mrb[6].mxu0 }
 0x117   : > { %v774_v51 = vmax.f32 %v703_v49, %v768_v50  ;;  %v770_v53 = vpop.f32.mrb[6].mxu1  ;;  %v706_v54 = vpop.f32.mrb[7].mxu0 }
 0x118   : > { %v771_v55 = vpop.f32.mrb[7].mxu1  ;;  %v775_v56 = vmax.f32 %v641_v37, %v773_v48 }
 0x119   : > { %v776_v57 = vmax.f32 %v642_v40, %v774_v51 }
 0x11a   : > { %v783_v58 = vadd.f32 %v781_v45, %v775_v56 }
 0x11b   : > { %v784_v59 = vadd.f32 %v781_v45, %v776_v57 }
 0x11c   : > { %v785_v60 = vmax.f32 %v783_v58, 0.0 }
 0x11d   : > { %v786_v61 = vmax.f32 %v784_v59, 0.0 }
 0x11f   : > { %v962_v62 = vpack.c.bf16 %v786_v61, %v785_v60 }
 0x121   : > { %795 = vst [vmem:[%s503_s10] sm:$0xff] %v962_v62 }
 0x122 PF: > { %p13_p9 = scmp.ge.s32.totalorder %s1090_s25, 4   ;;  %s1170_s21 = smov %s1031_s22 }
 0x123   : > { %s1171_s22 = smov %s1099_s28  ;;  %s1172_s23 = smov %s1090_s25 }
 0x124   :  { %15 = sbr.rel (!%p13_p9) target bundleno = 2 (0x2), region = 255 }

// kernel: custom_net_forward.5
= control target key start
LH: loop header
LB: loop body
LE: loop exit
PB: predicated region body
PF: predicated region fallthrough
CT: control target
= control target key end

     0   :  { %s568_s12 = smov 0   ;;  %s570_s13 = smov 0   ;;  %s626_s0 = inlined_call_operand.vmem [shape: bf16[8,96], index: 0, kind: input, shape index: {}]   ;;  %s627_s1 = inlined_call_operand.vmem [shape: f32[8,1], index: 1, kind: input, shape index: {}]   ;;  %s628_s2 = inlined_call_operand.vmem [shape: bf16[96,512], index: 2, kind: input, shape index: {}]   ;;  %s629_s3 = inlined_call_operand.vmem [shape: bf16[8,512], index: 3, kind: output, shape index: {}]  }
   0x1   :  { %s572_s14 = smov 0  }
   0x2 LB: > { %s450_s15 = sadd.s32 4294967295, %s545_s14   ;;  %s585_s16 = sadd.s32 1, %s545_s14   ;;  %s545_s14 = sphi %s572_s14, %s632_s14   ;;  %s541_s13 = sphi %s570_s13, %s631_s13   ;;  %s537_s12 = sphi %s568_s12, %s630_s12  }
   0x3   : > { %s59_s17 = ssub.s32 %s545_s14, %s585_s16  ;;  %s62_s18 = sadd.s32 1, %s541_s13 }
   0x4   : > { %p60_p0 = scmp.eq.s32.totalorder %s59_s17, 0  ;;  %p69_p1 = scmp.ne.s32.totalorder %s541_s13, %s537_s12 }
   0x5   : > { %p70_p2 = scmp.eq.s32.totalorder %s545_s14, 0  ;;  %p453_p4 = scmp.ge.s32.totalorder %s545_s14, 2 }
   0x6   : > { %s594_s19 = scalar_select %p60_p0, %s541_s13, %s62_s18  }
   0x7   : > { %p71_p3 = por %p70_p2, %p69_p1  ;;  %127 = sbr.rel (%p453_p4) target bundleno = 24 (0x18), region = 24 }
   0xe   : > { %130 = sbr.rel (!%p71_p3) target bundleno = 24 (0x18), region = 28  ;;  %s132_s20 = sand.u32 (%p71_p3), 1, %s541_s13  }
   0xf   : > { %s475_s21 = sshll.u32 (%p71_p3), %s545_s14, 3  ;;  %s477_s22 = smul.u32 (%p71_p3), 96, %s132_s20 }
  0x10   : > { %s137_s25 = scalar_lea.vmem (%p71_p3), %s628_s2, %s475_s21 }
  0x11   : > { %v187_v0 = vld [vmem:[%s137_s25] sm:$0xff] (%p71_p3)  ;;  %v189_v1 = vld [vmem:[%s137_s25 + $0x10] sm:$0xff] (%p71_p3)  ;;  %s134_s26 = scalar_lea.vmem (%p71_p3), [#allocation2], %s477_s22 }
  0x12   : > { %v191_v2 = vld [vmem:[%s137_s25 + $0x20] sm:$0xff] (%p71_p3)  ;;  %v193_v3 = vld [vmem:[%s137_s25 + $0x30] sm:$0xff] (%p71_p3)  ;;  %188 = vst [vmem:[%s134_s26] sm:$0xff] (%p71_p3), %v187_v0  ;;  %190 = vst [vmem:[%s134_s26 + $0x8] sm:$0xff] (%p71_p3), %v189_v1 }
  0x13   : > { %v195_v4 = vld [vmem:[%s137_s25 + $0x40] sm:$0xff] (%p71_p3)  ;;  %v197_v5 = vld [vmem:[%s137_s25 + $0x50] sm:$0xff] (%p71_p3)  ;;  %192 = vst [vmem:[%s134_s26 + $0x10] sm:$0xff] (%p71_p3), %v191_v2  ;;  %194 = vst [vmem:[%s134_s26 + $0x18] sm:$0xff] (%p71_p3), %v193_v3 }
  0x14   : > { %196 = vst [vmem:[%s134_s26 + $0x20] sm:$0xff] (%p71_p3), %v195_v4  ;;  %198 = vst [vmem:[%s134_s26 + $0x28] sm:$0xff] (%p71_p3), %v197_v5  ;;  %v199_v6 = vld [vmem:[%s137_s25 + $0x60] sm:$0xff] (%p71_p3)  ;;  %v201_v7 = vld [vmem:[%s137_s25 + $0x70] sm:$0xff] (%p71_p3) }
  0x15   : > { %v203_v8 = vld [vmem:[%s137_s25 + $0x80] sm:$0xff]  ;;  %200 = vst [vmem:[%s134_s26 + $0x30] sm:$0xff] %v199_v6  ;;  %202 = vst [vmem:[%s134_s26 + $0x38] sm:$0xff] %v201_v7  ;;  %v205_v9 = vld [vmem:[%s137_s25 + $0x90] sm:$0xff] }
  0x16   : > { %204 = vst [vmem:[%s134_s26 + $0x40] sm:$0xff] %v203_v8  ;;  %v207_v10 = vld [vmem:[%s137_s25 + $0xa0] sm:$0xff]  ;;  %v209_v11 = vld [vmem:[%s137_s25 + $0xb0] sm:$0xff]  ;;  %206 = vst [vmem:[%s134_s26 + $0x48] sm:$0xff] %v205_v9 }
  0x17   : > { %208 = vst [vmem:[%s134_s26 + $0x50] sm:$0xff] %v207_v10  ;;  %210 = vst [vmem:[%s134_s26 + $0x58] sm:$0xff] %v209_v11 }
  0x18 PF: > { %p456_p5 = scmp.ge.s32.totalorder %s545_s14, 1  ;;  %p215_p6 = scmp.lt.s32.totalorder %s545_s14, 3 }
  0x1a   : > { %p216_p7 = pnand %p456_p5, %p215_p6 }
  0x1b   : > { %s222_s27 = sand.u32 (!%p216_p7), 1, %s537_s12   ;;  %v266_v12 = vld [vmem:[%s627_s1] sm:$0xff] (!%p216_p7)  ;;  %v547_v13 = vmov (!%p216_p7), 0   ;;  %vm332_vm0 = vcmask (!%p216_p7), 785408   ;;  %s457_s7 = sshll.u32 (!%p216_p7), %s450_s15, 1 }
  0x1c   : > { %219 = sbr.rel (%p216_p7) target bundleno = 277 (0x115), region = 66  ;;  %368 = vmatprep.mubr.bf16.mxu0 (!%p216_p7), %v547_v13  ;;  %504 = vset.pattern.permute.xlu0 (!%p216_p7), %v547_v13  ;;  %v253_v26 = vld [vmem:[%s626_s0] sm:$0xf] (!%p216_p7)  ;;  %p247_p8 = scmp.lt.s32.totalorder (!%p216_p7), %s457_s7, 3 }
  0x1d   : > { %s478_s30 = smul.u32 (!%p216_p7), 96, %s222_s27  ;;  %269 = vperm.xlu0 (!%p216_p7), %504, %v266_v12  }
  0x1f   : > { %s224_s4 = scalar_lea.vmem (!%p216_p7), [#allocation2], %s478_s30 }
  0x20   : > { %v505_v14 = vld [vmem:[%s224_s4 + $0x4] ss:$8 sps:$4 sm:$0xff] (!%p216_p7)   ;;  %v507_v15 = vld [vmem:[%s224_s4] ss:$8 sps:$4 sm:$0xff] (!%p216_p7)   ;;  %v508_v16 = vld [vmem:[%s224_s4 + $0x14] ss:$8 sps:$4 sm:$0xff] (!%p216_p7)  }
  0x21   : > { %336 = vmatprep.subr.bf16.mxu0 (!%p216_p7), %v505_v14  ;;  %v510_v17 = vld [vmem:[%s224_s4 + $0x10] ss:$8 sps:$4 sm:$0xff] (!%p216_p7)   ;;  %v511_v18 = vld [vmem:[%s224_s4 + $0x24] ss:$8 sps:$4 sm:$0xff] (!%p216_p7)   ;;  %v513_v19 = vld [vmem:[%s224_s4 + $0x20] ss:$8 sps:$4 sm:$0xff] (!%p216_p7)  }
  0x22   : > { %337 = vmatpush1.bf16.msra.mxu0 (!%p216_p7), %v507_v15  ;;  %v514_v20 = vld [vmem:[%s224_s4 + $0x34] ss:$8 sps:$4 sm:$0xff] (!%p216_p7)   ;;  %v516_v21 = vld [vmem:[%s224_s4 + $0x30] ss:$8 sps:$4 sm:$0xff] (!%p216_p7)   ;;  %v517_v22 = vld [vmem:[%s224_s4 + $0x44] ss:$8 sps:$4 sm:$0xff] (!%p216_p7)  }
  0x23   : > { %338 = vmatprep.subr.bf16.mxu0 %v508_v16  ;;  %v519_v23 = vld [vmem:[%s224_s4 + $0x40] ss:$8 sps:$4 sm:$0xff]   ;;  %v520_v24 = vld [vmem:[%s224_s4 + $0x54] ss:$8 sps:$4 sm:$0xff]   ;;  %v522_v25 = vld [vmem:[%s224_s4 + $0x50] ss:$8 sps:$4 sm:$0xff]  }
  0x24   : > { %s634_s7 = smov (!%p247_p8, %s457_s7), 3 }
  0x25   : > { %s458_s8 = sshll.u32 %s634_s7, 2 }
  0x26   : > { %339 = vmatpush1.bf16.msra.mxu0 %v510_v17  ;;  %s250_s11 = scalar_lea.vmem %s629_s3, %s458_s8 }
  0x27   : > { %340 = vmatprep.subr.bf16.mxu0 %v511_v18 }
  0x2a   : > { %341 = vmatpush1.bf16.msra.mxu0 %v513_v19 }
  0x2b   : > { %342 = vmatprep.subr.bf16.mxu0 %v514_v20 }
  0x2e   : > { %343 = vmatpush1.bf16.msra.mxu0 %v516_v21 }
  0x2f   : > { %344 = vmatprep.subr.bf16.mxu0 %v517_v22 }
  0x32   : > { %345 = vmatpush1.bf16.msra.mxu0 %v519_v23 }
  0x33   : > { %346 = vmatprep.subr.bf16.mxu0 %v520_v24 }
  0x36   : > { %347 = vmatpush1.bf16.msra.mxu0 %v522_v25 }
  0x39   : > { %471 = vmatmul.mubr.msk.bf16.vlgmr.msra.gmra.mrb[0].mxu0 %vm332_vm0, %v253_v26 }
  0x9c   : > { %v270_v27 = vpop.permute.xlu0 %269 }
 0x10c   : > { %v370_v28 = vpop.f32.mrb[0].mxu0 }
 0x10d   : > { %v371_v29 = vadd.f32 %v370_v28, %v270_v27  ;;  %v372_v30 = vpop.f32.mrb[1].mxu0 }
 0x10e   : > { %v373_v31 = vadd.f32 %v372_v30, %v270_v27  ;;  %v374_v32 = vpop.f32.mrb[2].mxu0 }
 0x10f   : > { %v377_v33 = vmax.f32 %v371_v29, 0.0  ;;  %v375_v34 = vpop.f32.mrb[3].mxu0 }
 0x110   : > { %v378_v35 = vmax.f32 %v373_v31, 0.0 }
 0x112   : > { %v476_v36 = vpack.c.bf16 %v378_v35, %v377_v33 }
 0x114   : > { %387 = vst [vmem:[%s250_s11] sm:$0xff] %v476_v36 }
 0x115 PF: > { %p10_p9 = scmp.ge.s32.totalorder %s585_s16, 4   ;;  %s630_s12 = smov %s541_s13 }
 0x116   : > { %s631_s13 = smov %s594_s19  ;;  %s632_s14 = smov %s585_s16 }
 0x117   :  { %12 = sbr.rel (!%p10_p9) target bundleno = 2 (0x2), region = 105 }

// kernel: custom_net_forward.6
= control target key start
LH: loop header
LB: loop body
LE: loop exit
PB: predicated region body
PF: predicated region fallthrough
CT: control target
= control target key end

     0   :  { %v586_v0 = vmov 0.0   ;;  %vm587_vm0 = vmmov 0   ;;  %v588_v4 = vmov 0   ;;  %vm79_vm1 = vcmask 785408   ;;  %s744_s2 = inlined_call_operand.vmem [shape: bf16[96,128], index: 2, kind: input, shape index: {}]   ;;  %s745_s3 = inlined_call_operand.vmem [shape: bf16[96,128], index: 3, kind: input, shape index: {}]   ;;  %s746_s0 = inlined_call_operand.vmem [shape: bf16[16,96], index: 0, kind: input, shape index: {}]   ;;  %s747_s4 = inlined_call_operand.vmem [shape: bf16[96,128], index: 4, kind: input, shape index: {}]   ;;  %s748_s5 = inlined_call_operand.vmem [shape: bf16[96,128], index: 5, kind: input, shape index: {}]   ;;  %s749_s1 = inlined_call_operand.vmem [shape: f32[16,1], index: 1, kind: input, shape index: {}]   ;;  %s750_s6 = inlined_call_operand.vmem [shape: bf16[16,128], index: 6, kind: output, shape index: {}]  }
   0x1   :  { %493 = vmatprep.subr.bf16.mxu0 %v586_v0  ;;  %509 = vmatprep.subr.bf16.mxu1 %v586_v0  ;;  %v561_v1 = vld [vmem:[%s744_s2] sm:$0xff]   ;;  %v563_v3 = vld [vmem:[%s744_s2 + $0x8] sm:$0xff]   ;;  %v565_v6 = vld [vmem:[%s744_s2 + $0x10] sm:$0xff]  }
   0x2   :  { %v562_v2 = vld [vmem:[%s745_s3] sm:$0xff]   ;;  %505 = vmatprep.mubr.msk.bf16.mxu0 %vm587_vm0, %v586_v0  ;;  %521 = vmatprep.mubr.msk.bf16.mxu1 %vm587_vm0, %v586_v0  ;;  %v564_v5 = vld [vmem:[%s745_s3 + $0x8] sm:$0xff]   ;;  %v566_v7 = vld [vmem:[%s745_s3 + $0x10] sm:$0xff]  }
   0x3   :  { %494 = vmatpush3.bf16.msra.mxu0 %v561_v1  ;;  %560 = vset.pattern.permute.xlu0 %v588_v4  ;;  %v567_v8 = vld [vmem:[%s744_s2 + $0x18] sm:$0xff]   ;;  %v569_v10 = vld [vmem:[%s744_s2 + $0x20] sm:$0xff]   ;;  %v571_v12 = vld [vmem:[%s744_s2 + $0x28] sm:$0xff]  }
   0x4   :  { %510 = vmatpush3.bf16.msra.mxu1 %v562_v2  ;;  %495 = vmatprep.subr.bf16.mxu0 %v586_v0  ;;  %v568_v9 = vld [vmem:[%s745_s3 + $0x18] sm:$0xff]   ;;  %v570_v11 = vld [vmem:[%s745_s3 + $0x20] sm:$0xff]   ;;  %v572_v13 = vld [vmem:[%s745_s3 + $0x28] sm:$0xff]  }
   0x5   :  { %511 = vmatprep.subr.bf16.mxu1 %v586_v0  ;;  %v573_v14 = vld [vmem:[%s746_s0] sm:$0xff]   ;;  %v576_v17 = vld [vmem:[%s747_s4 + $0x8] sm:$0xff]   ;;  %v578_v20 = vld [vmem:[%s747_s4 + $0x10] sm:$0xff]  }
   0x6   :  { %v574_v15 = vld [vmem:[%s747_s4] sm:$0xff]   ;;  %v577_v19 = vld [vmem:[%s748_s5 + $0x8] sm:$0xff]   ;;  %v579_v22 = vld [vmem:[%s748_s5 + $0x10] sm:$0xff]  }
   0x7   :  { %496 = vmatpush3.bf16.msra.mxu0 %v563_v3  ;;  %v575_v16 = vld [vmem:[%s748_s5] sm:$0xff]   ;;  %v398_v21 = vld [vmem:[%s749_s1 + $0x8] sm:$0xff]  ;;  %v580_v23 = vld [vmem:[%s747_s4 + $0x18] sm:$0xff]  }
   0x8   :  { %512 = vmatpush3.bf16.msra.mxu1 %v564_v5  ;;  %497 = vmatprep.subr.bf16.mxu0 %v586_v0  ;;  %v397_v18 = vld [vmem:[%s749_s1] sm:$0xff]  ;;  %v581_v24 = vld [vmem:[%s748_s5 + $0x18] sm:$0xff]   ;;  %v584_v27 = vld [vmem:[%s747_s4 + $0x28] sm:$0xff]  }
   0x9   :  { %513 = vmatprep.subr.bf16.mxu1 %v586_v0  ;;  %401 = vperm.xlu0 %560, %v397_v18   ;;  %v582_v25 = vld [vmem:[%s747_s4 + $0x20] sm:$0xff]   ;;  %v585_v28 = vld [vmem:[%s748_s5 + $0x28] sm:$0xff]  }
   0xa   :  { %v583_v26 = vld [vmem:[%s748_s5 + $0x20] sm:$0xff]  }
   0xb   :  { %498 = vmatpush3.bf16.msra.mxu0 %v565_v6 }
   0xc   :  { %514 = vmatpush3.bf16.msra.mxu1 %v566_v7  ;;  %499 = vmatprep.subr.bf16.mxu0 %v586_v0 }
   0xd   :  { %515 = vmatprep.subr.bf16.mxu1 %v586_v0  ;;  %406 = vperm.xlu0 %560, %v398_v21  }
   0xf   :  { %500 = vmatpush3.bf16.msra.mxu0 %v567_v8 }
  0x10   :  { %516 = vmatpush3.bf16.msra.mxu1 %v568_v9  ;;  %501 = vmatprep.subr.bf16.mxu0 %v586_v0 }
  0x11   :  { %517 = vmatprep.subr.bf16.mxu1 %v586_v0 }
  0x13   :  { %502 = vmatpush3.bf16.msra.mxu0 %v569_v10 }
  0x14   :  { %518 = vmatpush3.bf16.msra.mxu1 %v570_v11  ;;  %503 = vmatprep.subr.bf16.mxu0 %v586_v0 }
  0x15   :  { %519 = vmatprep.subr.bf16.mxu1 %v586_v0 }
  0x17   :  { %504 = vmatpush3.bf16.msra.mxu0 %v571_v12 }
  0x18   :  { %520 = vmatpush3.bf16.msra.mxu1 %v572_v13  ;;  %525 = vmatprep.subr.bf16.mxu0 %v586_v0 }
  0x19   :  { %541 = vmatprep.subr.bf16.mxu1 %v586_v0 }
  0x1a   :  { %506 = vmatmul.mubr.msk.bf16.vlgmr.msra.gmra.mrb[0].mxu0 %vm79_vm1, %v573_v14 }
  0x1b   :  { %522 = vmatmul.mubr.msk.bf16.vlgmr.msra.gmra.mrb[0].mxu1 %vm79_vm1, %v573_v14  ;;  %526 = vmatpush3.bf16.msra.mxu0 %v574_v15 }
  0x1c   :  { %542 = vmatpush3.bf16.msra.mxu1 %v575_v16  ;;  %527 = vmatprep.subr.bf16.mxu0 %v586_v0 }
  0x1d   :  { %543 = vmatprep.subr.bf16.mxu1 %v586_v0  ;;  %537 = vmatprep.mubr.msk.bf16.mxu0 %vm587_vm0, %v586_v0 }
  0x1e   :  { %553 = vmatprep.mubr.msk.bf16.mxu1 %vm587_vm0, %v586_v0 }
  0x1f   :  { %528 = vmatpush3.bf16.msra.mxu0 %v576_v17 }
  0x20   :  { %544 = vmatpush3.bf16.msra.mxu1 %v577_v19  ;;  %529 = vmatprep.subr.bf16.mxu0 %v586_v0 }
  0x21   :  { %545 = vmatprep.subr.bf16.mxu1 %v586_v0 }
  0x23   :  { %530 = vmatpush3.bf16.msra.mxu0 %v578_v20 }
  0x24   :  { %546 = vmatpush3.bf16.msra.mxu1 %v579_v22  ;;  %531 = vmatprep.subr.bf16.mxu0 %v586_v0 }
  0x25   :  { %547 = vmatprep.subr.bf16.mxu1 %v586_v0 }
  0x27   :  { %532 = vmatpush3.bf16.msra.mxu0 %v580_v23 }
  0x28   :  { %548 = vmatpush3.bf16.msra.mxu1 %v581_v24  ;;  %533 = vmatprep.subr.bf16.mxu0 %v586_v0 }
  0x29   :  { %549 = vmatprep.subr.bf16.mxu1 %v586_v0 }
  0x2b   :  { %534 = vmatpush3.bf16.msra.mxu0 %v582_v25 }
  0x2c   :  { %550 = vmatpush3.bf16.msra.mxu1 %v583_v26  ;;  %535 = vmatprep.subr.bf16.mxu0 %v586_v0 }
  0x2d   :  { %551 = vmatprep.subr.bf16.mxu1 %v586_v0 }
  0x2f   :  { %536 = vmatpush3.bf16.msra.mxu0 %v584_v27 }
  0x30   :  { %552 = vmatpush3.bf16.msra.mxu1 %v585_v28 }
  0x32   :  { %538 = vmatmul.mubr.msk.bf16.vlgmr.msra.gmra.mrb[4].mxu0 %vm79_vm1, %v573_v14 }
  0x33   :  { %554 = vmatmul.mubr.msk.bf16.vlgmr.msra.gmra.mrb[4].mxu1 %vm79_vm1, %v573_v14 }
  0x88   :  { %v402_v39 = vpop.permute.xlu0 %401 }
  0x8c   :  { %v407_v53 = vpop.permute.xlu0 %406 }
  0xed   :  { %v117_v29 = vpop.f32.mrb[0].mxu0 }
  0xee   :  { %v206_v30 = vpop.f32.mrb[0].mxu1  ;;  %v507_v31 = vpop.f32.mrb[1].mxu0 }
  0xef   :  { %v213_v32 = vmax.f32 %v117_v29, %v206_v30  ;;  %v523_v33 = vpop.f32.mrb[1].mxu1  ;;  %v120_v34 = vpop.f32.mrb[2].mxu0 }
  0xf0   :  { %v209_v35 = vpop.f32.mrb[2].mxu1  ;;  %v508_v36 = vpop.f32.mrb[3].mxu0 }
  0xf1   :  { %v214_v37 = vmax.f32 %v120_v34, %v209_v35  ;;  %v524_v38 = vpop.f32.mrb[3].mxu1 }
 0x105   :  { %v297_v40 = vpop.f32.mrb[4].mxu0 }
 0x106   :  { %v386_v41 = vpop.f32.mrb[4].mxu1  ;;  %v539_v42 = vpop.f32.mrb[5].mxu0 }
 0x107   :  { %v393_v43 = vmax.f32 %v297_v40, %v386_v41  ;;  %v555_v44 = vpop.f32.mrb[5].mxu1  ;;  %v300_v45 = vpop.f32.mrb[6].mxu0 }
 0x108   :  { %v389_v46 = vpop.f32.mrb[6].mxu1  ;;  %v540_v47 = vpop.f32.mrb[7].mxu0 }
 0x109   :  { %v395_v48 = vmax.f32 %v213_v32, %v393_v43  ;;  %v394_v49 = vmax.f32 %v300_v45, %v389_v46  ;;  %v556_v50 = vpop.f32.mrb[7].mxu1 }
 0x10b   :  { %v409_v51 = vadd.f32 %v402_v39, %v395_v48  ;;  %v396_v52 = vmax.f32 %v214_v37, %v394_v49 }
 0x10d   :  { %v410_v54 = vadd.f32 %v407_v53, %v396_v52  ;;  %v411_v55 = vmax.f32 %v409_v51, 0.0 }
 0x10f   :  { %v412_v56 = vmax.f32 %v410_v54, 0.0 }
 0x111   :  { %v463_v57 = vpack.c.bf16 %v412_v56, %v411_v55 }
 0x113   :  { %464 = vst [vmem:[%s750_s6] sm:$0xff] %v463_v57  }

// kernel: custom_net_forward.7
= control target key start
LH: loop header
LB: loop body
LE: loop exit
PB: predicated region body
PF: predicated region fallthrough
CT: control target
= control target key end

     0   :  { %v826_v39 = vmov 0.0   ;;  %vm827_vm0 = vmmov 0   ;;  %s1030_s1 = inlined_call_operand.vmem [shape: bf16[512,128], index: 1, kind: input, shape index: {}]   ;;  %s1031_s0 = inlined_call_operand.vmem [shape: bf16[8,512], index: 0, kind: input, shape index: {}]   ;;  %s1032_s3 = inlined_call_operand.vmem [shape: bf16[128,128], index: 3, kind: input, shape index: {}]   ;;  %s1033_s5 = inlined_call_operand.vmem [shape: bf16[128,128], index: 5, kind: input, shape index: {}]   ;;  %s1034_s2 = inlined_call_operand.vmem [shape: f32[1,128], index: 2, kind: input, shape index: {}]   ;;  %s1035_s4 = inlined_call_operand.vmem [shape: f32[1,128], index: 4, kind: input, shape index: {}]   ;;  %s1036_s6 = inlined_call_operand.vmem [shape: f32[1,128], index: 6, kind: input, shape index: {}]   ;;  %s1037_s7 = inlined_call_operand.vmem [shape: f32[8,128], index: 7, kind: output, shape index: {}]  }
   0x1   :  { %v774_v0 = vld [vmem:[%s1030_s1 + $0x40] sm:$0xff]   ;;  %v778_v4 = vld [vmem:[%s1030_s1 + $0x48] sm:$0xff]   ;;  %v782_v8 = vld [vmem:[%s1030_s1 + $0x50] sm:$0xff]  }
   0x2   :  { %v775_v1 = vld [vmem:[%s1030_s1 + $0xc0] sm:$0xff]   ;;  %670 = vmatprep.subr.bf16.mxu0 %v774_v0  ;;  %v779_v5 = vld [vmem:[%s1030_s1 + $0xc8] sm:$0xff]   ;;  %v783_v9 = vld [vmem:[%s1030_s1 + $0xd0] sm:$0xff]  }
   0x3   :  { %v776_v2 = vld [vmem:[%s1030_s1] sm:$0xff]   ;;  %692 = vmatprep.subr.bf16.mxu1 %v775_v1  ;;  %v780_v6 = vld [vmem:[%s1030_s1 + $0x8] sm:$0xff]   ;;  %v784_v10 = vld [vmem:[%s1030_s1 + $0x10] sm:$0xff]  }
   0x4   :  { %v777_v3 = vld [vmem:[%s1030_s1 + $0x80] sm:$0xff]   ;;  %671 = vmatpush3.bf16.msra.mxu0 %v776_v2  ;;  %v781_v7 = vld [vmem:[%s1030_s1 + $0x88] sm:$0xff]   ;;  %v785_v11 = vld [vmem:[%s1030_s1 + $0x90] sm:$0xff]  }
   0x5   :  { %693 = vmatpush3.bf16.msra.mxu1 %v777_v3  ;;  %672 = vmatprep.subr.bf16.mxu0 %v778_v4  ;;  %v786_v12 = vld [vmem:[%s1030_s1 + $0x58] sm:$0xff]   ;;  %v790_v16 = vld [vmem:[%s1030_s1 + $0x60] sm:$0xff]   ;;  %v794_v20 = vld [vmem:[%s1030_s1 + $0x68] sm:$0xff]  }
   0x6   :  { %694 = vmatprep.subr.bf16.mxu1 %v779_v5  ;;  %v787_v13 = vld [vmem:[%s1030_s1 + $0xd8] sm:$0xff]   ;;  %v791_v17 = vld [vmem:[%s1030_s1 + $0xe0] sm:$0xff]   ;;  %v795_v21 = vld [vmem:[%s1030_s1 + $0xe8] sm:$0xff]  }
   0x7   :  { %v788_v14 = vld [vmem:[%s1030_s1 + $0x18] sm:$0xff]   ;;  %v792_v18 = vld [vmem:[%s1030_s1 + $0x20] sm:$0xff]   ;;  %v796_v22 = vld [vmem:[%s1030_s1 + $0x28] sm:$0xff]  }
   0x8   :  { %673 = vmatpush3.bf16.msra.mxu0 %v780_v6  ;;  %v789_v15 = vld [vmem:[%s1030_s1 + $0x98] sm:$0xff]   ;;  %v793_v19 = vld [vmem:[%s1030_s1 + $0xa0] sm:$0xff]   ;;  %v797_v23 = vld [vmem:[%s1030_s1 + $0xa8] sm:$0xff]  }
   0x9   :  { %695 = vmatpush3.bf16.msra.mxu1 %v781_v7  ;;  %674 = vmatprep.subr.bf16.mxu0 %v782_v8  ;;  %v798_v24 = vld [vmem:[%s1030_s1 + $0x70] sm:$0xff]   ;;  %v802_v28 = vld [vmem:[%s1030_s1 + $0x78] sm:$0xff]   ;;  %v27_v32 = vld [vmem:[%s1031_s0] sm:$0xff] }
   0xa   :  { %696 = vmatprep.subr.bf16.mxu1 %v783_v9  ;;  %v799_v25 = vld [vmem:[%s1030_s1 + $0xf0] sm:$0xff]   ;;  %v803_v29 = vld [vmem:[%s1030_s1 + $0xf8] sm:$0xff]   ;;  %v28_v33 = vld [vmem:[%s1031_s0 + $0x8] sm:$0xff]  ;;  %v616_v34 = vcombine.low %v27_v32, %v27_v32  ;;  %v617_v35 = vcombine.high %v27_v32, %v27_v32 }
   0xb   :  { %v800_v26 = vld [vmem:[%s1030_s1 + $0x30] sm:$0xff]   ;;  %v804_v30 = vld [vmem:[%s1030_s1 + $0x38] sm:$0xff]   ;;  %v618_v36 = vcombine.low %v28_v33, %v28_v33  ;;  %v619_v37 = vcombine.high %v28_v33, %v28_v33  ;;  %v810_v38 = vld [vmem:[%s1032_s3] sm:$0xff]  }
   0xc   :  { %675 = vmatpush3.bf16.msra.mxu0 %v784_v10  ;;  %v801_v27 = vld [vmem:[%s1030_s1 + $0xb0] sm:$0xff]   ;;  %v805_v31 = vld [vmem:[%s1030_s1 + $0xb8] sm:$0xff]   ;;  %338 = vmatprep.mubr.bf16.mxu0 %v617_v35  ;;  %v811_v40 = vld [vmem:[%s1032_s3 + $0x8] sm:$0xff]  }
   0xd   :  { %697 = vmatpush3.bf16.msra.mxu1 %v785_v11  ;;  %676 = vmatprep.subr.bf16.mxu0 %v786_v12  ;;  %v812_v41 = vld [vmem:[%s1032_s3 + $0x10] sm:$0xff]   ;;  %v813_v42 = vld [vmem:[%s1032_s3 + $0x18] sm:$0xff]   ;;  %v814_v43 = vld [vmem:[%s1032_s3 + $0x20] sm:$0xff]  }
   0xe   :  { %698 = vmatprep.subr.bf16.mxu1 %v787_v13  ;;  %378 = vmatprep.mubr.bf16.mxu1 %v619_v37  ;;  %v815_v44 = vld [vmem:[%s1032_s3 + $0x28] sm:$0xff]   ;;  %v816_v45 = vld [vmem:[%s1032_s3 + $0x30] sm:$0xff]   ;;  %v817_v46 = vld [vmem:[%s1032_s3 + $0x38] sm:$0xff]  }
   0xf   :  { %v818_v47 = vld [vmem:[%s1033_s5] sm:$0xff]   ;;  %v819_v48 = vld [vmem:[%s1033_s5 + $0x8] sm:$0xff]   ;;  %v820_v49 = vld [vmem:[%s1033_s5 + $0x10] sm:$0xff]  }
  0x10   :  { %677 = vmatpush3.bf16.msra.mxu0 %v788_v14  ;;  %v821_v50 = vld [vmem:[%s1033_s5 + $0x18] sm:$0xff]   ;;  %v822_v51 = vld [vmem:[%s1033_s5 + $0x20] sm:$0xff]   ;;  %v823_v52 = vld [vmem:[%s1033_s5 + $0x28] sm:$0xff]  }
  0x11   :  { %699 = vmatpush3.bf16.msra.mxu1 %v789_v15  ;;  %678 = vmatprep.subr.bf16.mxu0 %v790_v16  ;;  %v824_v53 = vld [vmem:[%s1033_s5 + $0x30] sm:$0xff]   ;;  %v615_v56 = vld [vmem:[%s1034_s2] ss:$0 sm:$0xff]  ;;  %v825_v4 = vld [vmem:[%s1033_s5 + $0x38] sm:$0xff]  }
  0x12   :  { %700 = vmatprep.subr.bf16.mxu1 %v791_v17  ;;  %v652_v5 = vld [vmem:[%s1035_s4] ss:$0 sm:$0xff] }
  0x13   :  { %v661_v12 = vld [vmem:[%s1036_s6] ss:$0 sm:$0xff] }
  0x14   :  { %679 = vmatpush3.bf16.msra.mxu0 %v792_v18 }
  0x15   :  { %701 = vmatpush3.bf16.msra.mxu1 %v793_v19  ;;  %680 = vmatprep.subr.bf16.mxu0 %v794_v20 }
  0x16   :  { %702 = vmatprep.subr.bf16.mxu1 %v795_v21 }
  0x18   :  { %681 = vmatpush3.bf16.msra.mxu0 %v796_v22 }
  0x19   :  { %703 = vmatpush3.bf16.msra.mxu1 %v797_v23  ;;  %682 = vmatprep.subr.bf16.mxu0 %v798_v24 }
  0x1a   :  { %704 = vmatprep.subr.bf16.mxu1 %v799_v25 }
  0x1c   :  { %683 = vmatpush3.bf16.msra.mxu0 %v800_v26 }
  0x1d   :  { %705 = vmatpush3.bf16.msra.mxu1 %v801_v27  ;;  %684 = vmatprep.subr.bf16.mxu0 %v802_v28 }
  0x1e   :  { %706 = vmatprep.subr.bf16.mxu1 %v803_v29 }
  0x20   :  { %685 = vmatpush3.bf16.msra.mxu0 %v804_v30 }
  0x21   :  { %707 = vmatpush3.bf16.msra.mxu1 %v805_v31  ;;  %732 = vmatprep.subr.bf16.mxu0 %v826_v39 }
  0x22   :  { %752 = vmatprep.subr.bf16.mxu1 %v826_v39 }
  0x23   :  { %339 = vmatmul.mubr.bf16.vlgmr.msra.gmra.mrb[0].mxu0 %v616_v34 }
  0x24   :  { %379 = vmatmul.mubr.bf16.vlgmr.msra.gmra.mrb[0].mxu1 %v618_v36  ;;  %733 = vmatpush3.bf16.msra.mxu0 %v810_v38 }
  0x25   :  { %734 = vmatprep.subr.bf16.mxu0 %v826_v39  ;;  %748 = vmatprep.mubr.msk.bf16.mxu0 %vm827_vm0, %v826_v39 }
  0x26   :  { %768 = vmatprep.mubr.msk.bf16.mxu1 %vm827_vm0, %v826_v39  ;;  %753 = vmatpush3.bf16.msra.mxu1 %v818_v47 }
  0x27   :  { %754 = vmatprep.subr.bf16.mxu1 %v826_v39 }
  0x28   :  { %735 = vmatpush3.bf16.msra.mxu0 %v811_v40 }
  0x29   :  { %736 = vmatprep.subr.bf16.mxu0 %v826_v39 }
  0x2a   :  { %755 = vmatpush3.bf16.msra.mxu1 %v819_v48 }
  0x2b   :  { %756 = vmatprep.subr.bf16.mxu1 %v826_v39 }
  0x2c   :  { %737 = vmatpush3.bf16.msra.mxu0 %v812_v41 }
  0x2d   :  { %738 = vmatprep.subr.bf16.mxu0 %v826_v39 }
  0x2e   :  { %757 = vmatpush3.bf16.msra.mxu1 %v820_v49 }
  0x2f   :  { %758 = vmatprep.subr.bf16.mxu1 %v826_v39 }
  0x30   :  { %739 = vmatpush3.bf16.msra.mxu0 %v813_v42 }
  0x31   :  { %740 = vmatprep.subr.bf16.mxu0 %v826_v39 }
  0x32   :  { %759 = vmatpush3.bf16.msra.mxu1 %v821_v50 }
  0x33   :  { %760 = vmatprep.subr.bf16.mxu1 %v826_v39 }
  0x34   :  { %741 = vmatpush3.bf16.msra.mxu0 %v814_v43 }
  0x35   :  { %742 = vmatprep.subr.bf16.mxu0 %v826_v39 }
  0x36   :  { %761 = vmatpush3.bf16.msra.mxu1 %v822_v51 }
  0x37   :  { %762 = vmatprep.subr.bf16.mxu1 %v826_v39 }
  0x38   :  { %743 = vmatpush3.bf16.msra.mxu0 %v815_v44 }
  0x39   :  { %744 = vmatprep.subr.bf16.mxu0 %v826_v39 }
  0x3a   :  { %763 = vmatpush3.bf16.msra.mxu1 %v823_v52 }
  0x3b   :  { %764 = vmatprep.subr.bf16.mxu1 %v826_v39 }
  0x3c   :  { %745 = vmatpush3.bf16.msra.mxu0 %v816_v45 }
  0x3d   :  { %746 = vmatprep.subr.bf16.mxu0 %v826_v39 }
  0x3e   :  { %765 = vmatpush3.bf16.msra.mxu1 %v824_v53 }
  0x3f   :  { %766 = vmatprep.subr.bf16.mxu1 %v826_v39 }
  0x40   :  { %747 = vmatpush3.bf16.msra.mxu0 %v817_v46 }
  0x42   :  { %767 = vmatpush3.bf16.msra.mxu1 %v825_v4 }
  0xf6   :  { %v686_v54 = vpop.f32.mrb[0].mxu0 }
  0xf7   :  { %v708_v55 = vpop.f32.mrb[0].mxu1  ;;  %v687_v57 = vpop.f32.mrb[1].mxu0 }
  0xf8   :  { %v709_v58 = vpop.f32.mrb[1].mxu1  ;;  %v688_v59 = vadd.f32 %v687_v57, %v686_v54  ;;  %v689_v61 = vpop.f32.mrb[2].mxu0 }
  0xf9   :  { %v710_v60 = vadd.f32 %v709_v58, %v708_v55  ;;  %v711_v62 = vpop.f32.mrb[2].mxu1  ;;  %v690_v63 = vpop.f32.mrb[3].mxu0 }
  0xfa   :  { %v712_v0 = vpop.f32.mrb[3].mxu1  ;;  %v341_v1 = vadd.f32 %v688_v59, %v615_v56 }
  0xfc   :  { %v381_v2 = vadd.f32 %v710_v60, %v341_v1 }
  0xfe   :  { %v386_v3 = vpack.c.bf16 %v381_v2, %v381_v2 }
 0x100   :  { %749 = vmatmul.mubr.bf16.vlgmr.msra.gmra.mrb[4].mxu0 %v386_v3 }
 0x1d3   :  { %v492_v6 = vpop.f32.mrb[4].mxu0 }
 0x1d4   :  { %v493_v7 = vadd.f32 %v652_v5, %v492_v6  ;;  %v750_v8 = vpop.f32.mrb[5].mxu0 }
 0x1d5   :  { %v495_v9 = vpop.f32.mrb[6].mxu0 }
 0x1d6   :  { %v498_v10 = vpack.c.bf16 %v493_v7, %v493_v7  ;;  %v751_v11 = vpop.f32.mrb[7].mxu0 }
 0x1d8   :  { %769 = vmatmul.mubr.bf16.vlgmr.msra.gmra.mrb[4].mxu1 %v498_v10 }
 0x2ab   :  { %v604_v13 = vpop.f32.mrb[4].mxu1 }
 0x2ac   :  { %v605_v14 = vadd.f32 %v661_v12, %v604_v13  ;;  %v770_v15 = vpop.f32.mrb[5].mxu1 }
 0x2ad   :  { %v607_v16 = vpop.f32.mrb[6].mxu1 }
 0x2ae   :  { %610 = vst [vmem:[%s1037_s7] sm:$0xff] %v605_v14  ;;  %v771_v17 = vpop.f32.mrb[7].mxu1 }

</bundles_post_ra>
